<compile_context>
chip_gen: v7x
topology: tpu7x:2x2x1
jax: 0.10.0
libtpu: 0.0.40
codegen_flags: <defaults>
</compile_context>

<pallas_src>
import functools

import jax
import jax.numpy as jnp
from jax.experimental import pallas as pl
from jax.experimental.pallas import tpu as pltpu

# Synthetic env dims (CartPole-like): observation dim 4, 2 actions.
N_STATE = 4
N_HIDDEN = 10
N_ACTIONS = 2

OUT_PAD = 128        # lane-dense output width (>= 128 -> unmasked stores)
MAX_TILE_B = 512     # max batch rows per grid step (multiple of 8 for f32)


def _round_up(x, m):
    return ((x + m - 1) // m) * m


def _net_kernel(x_ref, w1_ref, b1_ref, w2_ref, b2_ref, out_ref):
    # x: (TB, N_STATE), w1: (N_STATE, H), b1: (1, H),
    # w2: (H, OUT_PAD), b2: (1, OUT_PAD), out: (TB, OUT_PAD)  -- all f32.
    x = x_ref[...]
    h = jnp.dot(x, w1_ref[...], preferred_element_type=jnp.float32) + b1_ref[...]
    h = jnp.maximum(h, 0.0)  # ReLU
    out_ref[...] = (
        jnp.dot(h, w2_ref[...], preferred_element_type=jnp.float32) + b2_ref[...]
    )


def prepare_params(w1, b1, w2, b2):
    """One-time parameter prep (call after init / each optimizer step).

    Transposes to (in, out) layout, pads the output layer to OUT_PAD lanes so
    the kernel's store path is lane-dense, and casts to f32.
    """
    w1_t = jnp.asarray(w1, jnp.float32).T                    # (N_STATE, H)
    b1_2d = jnp.asarray(b1, jnp.float32).reshape(1, N_HIDDEN)

    w2_t = jnp.asarray(w2, jnp.float32).T                    # (H, A)
    w2_pad = jnp.zeros((N_HIDDEN, OUT_PAD), jnp.float32).at[:, :N_ACTIONS].set(w2_t)
    b2_pad = jnp.zeros((1, OUT_PAD), jnp.float32).at[:, :N_ACTIONS].set(
        jnp.asarray(b2, jnp.float32)
    )
    return w1_t, b1_2d, w2_pad, b2_pad


@functools.partial(jax.jit, static_argnames=())
def net_forward(x, w1_t, b1_2d, w2_pad, b2_pad):
    """Forward pass of Net.

    x: (B, N_STATE) float32
    (w1_t, b1_2d, w2_pad, b2_pad): output of prepare_params()
    returns (B, N_ACTIONS) float32
    """
    B = x.shape[0]
    x = x.astype(jnp.float32)

    # Batch tiling: TB rows per grid step (multiple of 8 for f32 sublanes).
    tb = min(MAX_TILE_B, _round_up(B, 8))
    b_pad = _round_up(B, tb)
    if b_pad != B:
        x = jnp.pad(x, ((0, b_pad - B), (0, 0)))
    num_tiles = b_pad // tb

    cost = pl.CostEstimate(
        flops=2 * b_pad * (N_STATE * N_HIDDEN + N_HIDDEN * OUT_PAD),
        transcendentals=0,
        bytes_accessed=4 * (
            b_pad * N_STATE + b_pad * OUT_PAD
            + N_STATE * N_HIDDEN + N_HIDDEN
            + N_HIDDEN * OUT_PAD + OUT_PAD
        ),
    )

    out_padded = pl.pallas_call(
        _net_kernel,
        out_shape=jax.ShapeDtypeStruct((b_pad, OUT_PAD), jnp.float32),
        grid=(num_tiles,),
        in_specs=[
            # x: one batch tile per grid step (pipelined, double-buffered).
            pl.BlockSpec((tb, N_STATE), lambda i: (i, 0)),
            # Weights/biases: constant block index -> fetched once, resident.
            pl.BlockSpec((N_STATE, N_HIDDEN), lambda i: (0, 0)),
            pl.BlockSpec((1, N_HIDDEN), lambda i: (0, 0)),
            pl.BlockSpec((N_HIDDEN, OUT_PAD), lambda i: (0, 0)),
            pl.BlockSpec((1, OUT_PAD), lambda i: (0, 0)),
        ],
        out_specs=pl.BlockSpec((tb, OUT_PAD), lambda i: (i, 0)),
        compiler_params=pltpu.CompilerParams(
            dimension_semantics=("parallel",),  # v7x: shard tiles across 2 TCs
        ),
        cost_estimate=cost,
    )(x, w1_t, b1_2d, w2_pad, b2_pad)

    # Layout plumbing back to the module's (B, N_ACTIONS) output.
    return out_padded[:B, :N_ACTIONS]


def init_params(key):
    """Deterministic parameter init, mirroring the module's __init__.

    fc1.weight ~ N(0, 0.1), out.weight ~ N(0, 0.1) (the PyTorch code intended
    .normal_(0, 0.1) for both). Biases set to zero.
    """
    k1, k2 = jax.random.split(key)
    w1 = 0.1 * jax.random.normal(k1, (N_HIDDEN, N_STATE), jnp.float32)
    b1 = jnp.zeros((N_HIDDEN,), jnp.float32)
    w2 = 0.1 * jax.random.normal(k2, (N_ACTIONS, N_HIDDEN), jnp.float32)
    b2 = jnp.zeros((N_ACTIONS,), jnp.float32)
    return w1, b1, w2, b2


def _reference(x, w1, b1, w2, b2):
    return jnp.maximum(x @ w1.T + b1, 0.0) @ w2.T + b2


if __name__ == "__main__":
    key = jax.random.PRNGKey(0)
    kx, kp, kx2 = jax.random.split(key, 3)

    w1, b1, w2, b2 = init_params(kp)
    params = prepare_params(w1, b1, w2, b2)   # one-time, out of the hot path

    # Small "act" batch (as in DQN action selection).
    batch = 2
    x = jax.random.normal(kx, (batch, N_STATE), jnp.float32)
    actions_value = net_forward(x, *params)
    jax.block_until_ready(actions_value)

    ref = _reference(x, w1, b1, w2, b2)
    assert actions_value.shape == (batch, N_ACTIONS)
    assert jnp.allclose(actions_value, ref, atol=1e-5, rtol=1e-5)

    # Larger "replay buffer" batch: exercises multi-tile grid + row padding.
    batch2 = 600
    x2 = jax.random.normal(kx2, (batch2, N_STATE), jnp.float32)
    out2 = net_forward(x2, *params)
    jax.block_until_ready(out2)
    ref2 = _reference(x2, w1, b1, w2, b2)
    assert out2.shape == (batch2, N_ACTIONS)
    assert jnp.allclose(out2, ref2, atol=1e-5, rtol=1e-5)

    print("KERNEL_OK")
</pallas_src>

<mosaic_0001>
module attributes {stable_mosaic.version = 11 : i64} {
  func.func @_net_kernel(%arg0: i32, %arg1: memref<8x4xf32, #tpu.memory_space<vmem>>, %arg2: memref<4x10xf32, #tpu.memory_space<vmem>>, %arg3: memref<1x10xf32, #tpu.memory_space<vmem>>, %arg4: memref<10x128xf32, #tpu.memory_space<vmem>>, %arg5: memref<1x128xf32, #tpu.memory_space<vmem>>, %arg6: memref<8x128xf32, #tpu.memory_space<vmem>>) attributes {dimension_semantics = [#tpu.dimension_semantics<parallel>], iteration_bounds = array<i64: 1>, scalar_prefetch = 0 : i64, scratch_operands = 0 : i64, tpu.core_type = #tpu.core_type<tc>, window_params = [{transform_indices = @transform_0, window_bounds = array<i64: 8, 4>}, {pipeline_mode = #tpu.pipeline_mode<synchronous>, transform_indices = @transform_1, window_bounds = array<i64: 4, 10>}, {pipeline_mode = #tpu.pipeline_mode<synchronous>, transform_indices = @transform_2, window_bounds = array<i64: 1, 10>}, {pipeline_mode = #tpu.pipeline_mode<synchronous>, transform_indices = @transform_3, window_bounds = array<i64: 10, 128>}, {pipeline_mode = #tpu.pipeline_mode<synchronous>, transform_indices = @transform_4, window_bounds = array<i64: 1, 128>}, {transform_indices = @transform_5, window_bounds = array<i64: 8, 128>}]} {
    %c0 = arith.constant 0 : index
    %c0_0 = arith.constant 0 : index
    %0 = vector.load %arg1[%c0, %c0_0] : memref<8x4xf32, #tpu.memory_space<vmem>>, vector<8x4xf32>
    %c0_1 = arith.constant 0 : index
    %c0_2 = arith.constant 0 : index
    %1 = vector.load %arg2[%c0_1, %c0_2] : memref<4x10xf32, #tpu.memory_space<vmem>>, vector<4x10xf32>
    %cst = arith.constant dense<0.000000e+00> : vector<8x10xf32>
    %2 = tpu.matmul %0, %1, %cst {dimension_numbers = #tpu.dot_dimension_numbers<[1], [0], [0], [1], [0, 0, 1, 1], [], []>} : vector<8x4xf32>, vector<4x10xf32>, vector<8x10xf32> -> vector<8x10xf32>
    %c0_3 = arith.constant 0 : index
    %c0_4 = arith.constant 0 : index
    %3 = vector.load %arg3[%c0_3, %c0_4] : memref<1x10xf32, #tpu.memory_space<vmem>>, vector<1x10xf32>
    %4 = vector.broadcast %3 : vector<1x10xf32> to vector<8x10xf32>
    %5 = arith.addf %2, %4 : vector<8x10xf32>
    %cst_5 = arith.constant 0.000000e+00 : f32
    %6 = vector.broadcast %cst_5 : f32 to vector<8x10xf32>
    %7 = arith.maximumf %5, %6 : vector<8x10xf32>
    %c0_6 = arith.constant 0 : index
    %c0_7 = arith.constant 0 : index
    %8 = vector.load %arg4[%c0_6, %c0_7] : memref<10x128xf32, #tpu.memory_space<vmem>>, vector<10x128xf32>
    %cst_8 = arith.constant dense<0.000000e+00> : vector<8x128xf32>
    %9 = tpu.matmul %7, %8, %cst_8 {dimension_numbers = #tpu.dot_dimension_numbers<[1], [0], [0], [1], [0, 0, 1, 1], [], []>} : vector<8x10xf32>, vector<10x128xf32>, vector<8x128xf32> -> vector<8x128xf32>
    %c0_9 = arith.constant 0 : index
    %c0_10 = arith.constant 0 : index
    %10 = vector.load %arg5[%c0_9, %c0_10] : memref<1x128xf32, #tpu.memory_space<vmem>>, vector<1x128xf32>
    %11 = vector.broadcast %10 : vector<1x128xf32> to vector<8x128xf32>
    %12 = arith.addf %9, %11 : vector<8x128xf32>
    %c0_11 = arith.constant 0 : index
    %c0_12 = arith.constant 0 : index
    %13 = vector.load %arg6[%c0_11, %c0_12] : memref<8x128xf32, #tpu.memory_space<vmem>>, vector<8x128xf32>
    tpu.vector_store %arg6[%c0_11, %c0_12], %12 {strides = array<i32>} : memref<8x128xf32, #tpu.memory_space<vmem>>, vector<8x128xf32>,
    return
  }
  func.func @transform_0(%arg0: i32) -> (i32, i32) {
    %c0_i32 = arith.constant 0 : i32
    %c0_i32_0 = arith.constant 0 : i32
    return %arg0, %c0_i32 : i32, i32
  }
  func.func @transform_1(%arg0: i32) -> (i32, i32) {
    %c0_i32 = arith.constant 0 : i32
    %c0_i32_0 = arith.constant 0 : i32
    %c0_i32_1 = arith.constant 0 : i32
    return %c0_i32, %c0_i32_0 : i32, i32
  }
  func.func @transform_2(%arg0: i32) -> (i32, i32) {
    %c0_i32 = arith.constant 0 : i32
    %c0_i32_0 = arith.constant 0 : i32
    %c0_i32_1 = arith.constant 0 : i32
    return %c0_i32, %c0_i32_0 : i32, i32
  }
  func.func @transform_3(%arg0: i32) -> (i32, i32) {
    %c0_i32 = arith.constant 0 : i32
    %c0_i32_0 = arith.constant 0 : i32
    %c0_i32_1 = arith.constant 0 : i32
    return %c0_i32, %c0_i32_0 : i32, i32
  }
  func.func @transform_4(%arg0: i32) -> (i32, i32) {
    %c0_i32 = arith.constant 0 : i32
    %c0_i32_0 = arith.constant 0 : i32
    %c0_i32_1 = arith.constant 0 : i32
    return %c0_i32, %c0_i32_0 : i32, i32
  }
  func.func @transform_5(%arg0: i32) -> (i32, i32) {
    %c0_i32 = arith.constant 0 : i32
    %c0_i32_0 = arith.constant 0 : i32
    return %arg0, %c0_i32 : i32, i32
  }
}

</mosaic_0001>

<bundles_post_ra>
// kernel: net_forward.1
= control target key start
LH: loop header
LB: loop body
LE: loop exit
PB: predicated region body
PF: predicated region fallthrough
CT: control target
= control target key end

     0   :  { %vm33_vm0 = vcmask 1043456   ;;  %vm29_vm1 = vcmask 31744   ;;  %v231_v0 = vmov 0.0   ;;  %vm232_vm2 = vmmov 0   ;;  %s286_s1 = inlined_call_operand.vmem [shape: f32[4,10], index: 1, kind: input, shape index: {}]   ;;  %s287_s0 = inlined_call_operand.vmem [shape: f32[8,4], index: 0, kind: input, shape index: {}]   ;;  %s288_s3 = inlined_call_operand.vmem [shape: f32[10,128], index: 3, kind: input, shape index: {}]   ;;  %s289_s2 = inlined_call_operand.vmem [shape: f32[1,10], index: 2, kind: input, shape index: {}]   ;;  %s290_s4 = inlined_call_operand.vmem [shape: f32[1,128], index: 4, kind: input, shape index: {}]   ;;  %s291_s5 = inlined_call_operand.vmem [shape: f32[8,128], index: 5, kind: output, shape index: {}]  }
   0x1   :  { %211 = vmatprep.subr.mxu0 %v231_v0  ;;  %v21_v1 = vld [vmem:[%s286_s1] sm:$0xf]  ;;  %213 = vmatprep.mubr.msk.f32.mxu0 %vm232_vm2, %v231_v0  ;;  %v109_v4 = vld [vmem:[%s288_s3 + $0x8] sm:$0x3]  ;;  %vm121_vm3 = vcmask 1041408   ;;  %v233_v6 = vmov 0.0|0.0  }
   0x2   :  { %v20_v2 = vld [vmem:[%s287_s0] sm:$0xff]  ;;  %212 = vmatpush3.msk.msra.mxu0 %vm33_vm0, %v21_v1  ;;  %220 = vmatprep.mubr.msk.f32.mxu1 %vm232_vm2, %v231_v0  ;;  %vm234_vm4 = vmmov 1   ;;  %vm117_vm6 = vcmask 80896  }
   0x3   :  { %214 = vmatmul.mubr.msk.f32.vlgmr.msra.gmra.mrb[0].mxu0 %vm29_vm1, %v20_v2  ;;  %v108_v3 = vld [vmem:[%s288_s3] sm:$0xff]  ;;  %223 = vmatprep.subr.bf16.mxu1 %v233_v6  ;;  %vm225_vm5 = vmpackc.low %vm121_vm3, %vm234_vm4 }
   0x4   :  { %v224_v5 = vpack.c.bf16 %v109_v4, %v108_v3  ;;  %v200_v7 = vld [vmem:[%s289_s2] ss:$0 sm:$0xff] }
   0x5   :  { %v203_v12 = vld [vmem:[%s290_s4] ss:$0 sm:$0xff] }
   0x6   :  { %226 = vmatpush3.bf16.msk.msra.mxu1 %vm225_vm5, %v224_v5 }
  0xd6   :  { %v103_v8 = vpop.f32.mrb[0].mxu0 }
  0xd7   :  { %v104_v9 = vadd.f32 %v200_v7, %v103_v8  ;;  %v215_v10 = vpop.f32.mrb[1].mxu0 }
  0xd9   :  { %v107_v11 = vmax.f32 %v104_v9, 0.0 }
  0xdb   :  { %221 = vmatmul.mubr.msk.f32.vlgmr.msra.gmra.mrb[0].mxu1 %vm117_vm6, %v107_v11 }
 0x1ae   :  { %v191_v13 = vpop.f32.mrb[0].mxu1 }
 0x1af   :  { %v192_v14 = vadd.f32 %v203_v12, %v191_v13  ;;  %v222_v15 = vpop.f32.mrb[1].mxu1 }
 0x1b1   :  { %195 = vst [vmem:[%s291_s5] sm:$0xff] %v192_v14 }

</bundles_post_ra>
